<compile_context>
chip_gen: v7x
topology: tpu7x:2x2x1
jax: 0.10.0
libtpu: 0.0.40
codegen_flags: <defaults>
</compile_context>

<pallas_src>
import math

import jax
import jax.numpy as jnp
from jax.experimental import pallas as pl
from jax.experimental.pallas import tpu as pltpu


# ----------------------------- Pallas kernels --------------------------------
def _add2_kernel(data_ref, tpos_ref, spos_ref, out_ref):
    # data_ref/tpos_ref: (rows, C) blocks; spos_ref: (1, C) VMEM-resident,
    # broadcast over rows.  Pure VPU adds, lane-dense store.
    out_ref[...] = data_ref[...] + tpos_ref[...] + spos_ref[...]


def _add1_kernel(data_ref, pos_ref, out_ref):
    # pos_ref is either a (rows, C) block (T_pos case) or a (1, C) resident
    # block (S_pos case, broadcast over rows).
    out_ref[...] = data_ref[...] + pos_ref[...]


# ------------------------------- block sizing --------------------------------
def _choose_row_block(T, row_bytes, target_block_bytes=4 << 20, max_rows=1024):
    """Pick a row tile: multiple of 8, ~target_block_bytes, <= max_rows rows."""
    if T <= 8:
        return T  # full extent (allowed even if not a multiple of 8)
    rows = (target_block_bytes // max(row_bytes, 1)) // 8 * 8
    rows = int(max(8, min(max_rows, rows)))
    if rows >= T:
        return T  # whole axis fits one block
    return rows


# --------------------------------- wrapper ------------------------------------
def position_embedding_pallas(data, t_pos=None, s_pos=None, *,
                              min_pallas_bytes=256 * 1024,
                              donate_data=False):
    """Position_Embedding.forward.

    data : (T, N, F)
    t_pos: (T, F) or None
    s_pos: (N, F) or None
    """
    T, N, F = data.shape
    dtype = data.dtype
    itemsize = jnp.dtype(dtype).itemsize

    if t_pos is None and s_pos is None:
        return data

    # Explicit dtype contract: position params are added (and stored) in
    # data's dtype - no silent promote-then-downcast inside the kernel.
    if t_pos is not None:
        t_pos = t_pos.astype(dtype)
    if s_pos is not None:
        s_pos = s_pos.astype(dtype)

    total_bytes = T * N * F * itemsize
    if total_bytes < min_pallas_bytes:
        # Tiny input: custom-call launch + per-step overhead dwarfs the work;
        # let XLA fuse the broadcast adds.
        out = data
        if t_pos is not None:
            out = out + t_pos[:, None, :]
        if s_pos is not None:
            out = out + s_pos[None, :, :]
        return out

    # Lane-dense restructure: (T, N, F) -> (T, C) with C = N*F on the lane axis.
    C = N * F
    data2d = data.reshape(T, C)  # free reshape (trailing contiguous axes)
    row_bytes = C * itemsize

    row_block = _choose_row_block(T, row_bytes)
    grid = (pl.cdiv(T, row_block),)

    row_spec = pl.BlockSpec((row_block, C), lambda i: (i, 0))
    const_spec = pl.BlockSpec((1, C), lambda i: (0, 0))  # VMEM-resident S_pos

    # Specialize on which position terms exist (no zero arrays, no dead adds).
    if t_pos is not None and s_pos is not None:
        kernel = _add2_kernel
        operands = (data2d, jnp.tile(t_pos, (1, N)), s_pos.reshape(1, C))
        in_specs = [row_spec, row_spec, const_spec]
    elif t_pos is not None:
        kernel = _add1_kernel
        operands = (data2d, jnp.tile(t_pos, (1, N)))
        in_specs = [row_spec, row_spec]
    else:
        kernel = _add1_kernel
        operands = (data2d, s_pos.reshape(1, C))
        in_specs = [row_spec, const_spec]

    # VMEM budget: <=3 double-buffered (rows, C) blocks + resident S_pos + slack.
    block_bytes = row_block * row_bytes
    vmem_limit = 2 * 3 * block_bytes + 4 * row_bytes + (1 << 20)
    vmem_limit = int(min(max(vmem_limit, 32 << 20), 56 << 20))  # v7x: 64 MiB phys

    out2d = pl.pallas_call(
        kernel,
        out_shape=jax.ShapeDtypeStruct((T, C), dtype),
        grid=grid,
        in_specs=in_specs,
        out_specs=row_spec,
        input_output_aliases=({0: 0} if donate_data else {}),
        compiler_params=pltpu.CompilerParams(
            # Row axis is independent per block -> shard across TCs on v7x.
            dimension_semantics=("parallel",),
            vmem_limit_bytes=vmem_limit,
        ),
    )(*operands)
    return out2d.reshape(T, N, F)


# ------------------------- deterministic param init --------------------------
def xavier_uniform(key, shape, dtype=jnp.float32):
    # nn.init.xavier_uniform_ for a 2-D tensor: fan_out = shape[0], fan_in = shape[1]
    fan_out, fan_in = shape
    bound = math.sqrt(6.0 / (fan_in + fan_out))
    return jax.random.uniform(key, shape, dtype=dtype, minval=-bound, maxval=bound)


# ------------------------------ reference (JAX) -------------------------------
def position_embedding_ref(data, t_pos, s_pos):
    out = data
    if t_pos is not None:
        out = out + t_pos[:, None, :]
    if s_pos is not None:
        out = out + s_pos[None, :, :]
    return out


if __name__ == "__main__":
    # Small shapes consistent with the module: tlen=T, chan_num=N, feat_num=F.
    T, N, F = 16, 8, 32

    key = jax.random.PRNGKey(0)
    k_data, k_t, k_s = jax.random.split(key, 3)

    data = jax.random.normal(k_data, (T, N, F), dtype=jnp.float32)
    t_pos = xavier_uniform(k_t, (T, F))
    s_pos = xavier_uniform(k_s, (N, F))
    ref = position_embedding_ref(data, t_pos, s_pos)

    # Both T/S flags set; force the Pallas path (demo shape is under the cutoff).
    out = jax.block_until_ready(
        position_embedding_pallas(data, t_pos, s_pos, min_pallas_bytes=0))
    assert out.shape == (T, N, F)
    assert jnp.allclose(out, ref, atol=1e-6, rtol=1e-6), "mismatch (both)"

    # Specialized variants: T-only and S-only (still through Pallas).
    out_t = jax.block_until_ready(
        position_embedding_pallas(data, t_pos, None, min_pallas_bytes=0))
    assert jnp.allclose(out_t, position_embedding_ref(data, t_pos, None),
                        atol=1e-6, rtol=1e-6), "mismatch (T only)"
    out_s = jax.block_until_ready(
        position_embedding_pallas(data, None, s_pos, min_pallas_bytes=0))
    assert jnp.allclose(out_s, position_embedding_ref(data, None, s_pos),
                        atol=1e-6, rtol=1e-6), "mismatch (S only)"

    # Tiny-input fallback path (default cutoff -> plain fused JAX).
    out_small = jax.block_until_ready(position_embedding_pallas(data, t_pos, s_pos))
    assert jnp.allclose(out_small, ref, atol=1e-6, rtol=1e-6), "mismatch (fallback)"

    # Larger shape to exercise the multi-block pipelined grid (2 row tiles).
    T2 = 2048
    d2 = jax.random.normal(jax.random.PRNGKey(1), (T2, N, F), dtype=jnp.float32)
    tp2 = xavier_uniform(jax.random.PRNGKey(2), (T2, F))
    out2 = jax.block_until_ready(position_embedding_pallas(d2, tp2, s_pos))
    assert jnp.allclose(out2, position_embedding_ref(d2, tp2, s_pos),
                        atol=1e-6, rtol=1e-6), "mismatch (tiled)"

    print("KERNEL_OK")
</pallas_src>

<mosaic_0001>
module attributes {stable_mosaic.version = 11 : i64} {
  func.func @_add2_kernel(%arg0: i32, %arg1: memref<16x256xf32, #tpu.memory_space<vmem>>, %arg2: memref<16x256xf32, #tpu.memory_space<vmem>>, %arg3: memref<1x256xf32, #tpu.memory_space<vmem>>, %arg4: memref<16x256xf32, #tpu.memory_space<vmem>>) attributes {dimension_semantics = [#tpu.dimension_semantics<parallel>], iteration_bounds = array<i64: 1>, scalar_prefetch = 0 : i64, scratch_operands = 0 : i64, tpu.core_type = #tpu.core_type<tc>, window_params = [{transform_indices = @transform_0, window_bounds = array<i64: 16, 256>}, {transform_indices = @transform_1, window_bounds = array<i64: 16, 256>}, {pipeline_mode = #tpu.pipeline_mode<synchronous>, transform_indices = @transform_2, window_bounds = array<i64: 1, 256>}, {transform_indices = @transform_3, window_bounds = array<i64: 16, 256>}]} {
    %c0 = arith.constant 0 : index
    %c0_0 = arith.constant 0 : index
    %0 = vector.load %arg1[%c0, %c0_0] : memref<16x256xf32, #tpu.memory_space<vmem>>, vector<16x256xf32>
    %c0_1 = arith.constant 0 : index
    %c0_2 = arith.constant 0 : index
    %1 = vector.load %arg2[%c0_1, %c0_2] : memref<16x256xf32, #tpu.memory_space<vmem>>, vector<16x256xf32>
    %2 = arith.addf %0, %1 : vector<16x256xf32>
    %c0_3 = arith.constant 0 : index
    %c0_4 = arith.constant 0 : index
    %3 = vector.load %arg3[%c0_3, %c0_4] : memref<1x256xf32, #tpu.memory_space<vmem>>, vector<1x256xf32>
    %4 = vector.broadcast %3 : vector<1x256xf32> to vector<16x256xf32>
    %5 = arith.addf %2, %4 : vector<16x256xf32>
    %c0_5 = arith.constant 0 : index
    %c0_6 = arith.constant 0 : index
    %6 = vector.load %arg4[%c0_5, %c0_6] : memref<16x256xf32, #tpu.memory_space<vmem>>, vector<16x256xf32>
    tpu.vector_store %arg4[%c0_5, %c0_6], %5 {strides = array<i32>} : memref<16x256xf32, #tpu.memory_space<vmem>>, vector<16x256xf32>,
    return
  }
  func.func @transform_0(%arg0: i32) -> (i32, i32) {
    %c0_i32 = arith.constant 0 : i32
    %c0_i32_0 = arith.constant 0 : i32
    return %arg0, %c0_i32 : i32, i32
  }
  func.func @transform_1(%arg0: i32) -> (i32, i32) {
    %c0_i32 = arith.constant 0 : i32
    %c0_i32_0 = arith.constant 0 : i32
    return %arg0, %c0_i32 : i32, i32
  }
  func.func @transform_2(%arg0: i32) -> (i32, i32) {
    %c0_i32 = arith.constant 0 : i32
    %c0_i32_0 = arith.constant 0 : i32
    %c0_i32_1 = arith.constant 0 : i32
    return %c0_i32, %c0_i32_0 : i32, i32
  }
  func.func @transform_3(%arg0: i32) -> (i32, i32) {
    %c0_i32 = arith.constant 0 : i32
    %c0_i32_0 = arith.constant 0 : i32
    return %arg0, %c0_i32 : i32, i32
  }
}

</mosaic_0001>

<bundles_post_ra>
// kernel: tpu_custom_call.1
= control target key start
LH: loop header
LB: loop body
LE: loop exit
PB: predicated region body
PF: predicated region fallthrough
CT: control target
= control target key end

     0   :  { %8 = vsyncpa [#allocation3], 0  ;;  %s243_s0 = inlined_call_operand.hbm [shape: f32[16,256], index: 0, kind: input, shape index: {}]   ;;  %s244_s1 = inlined_call_operand.hbm [shape: f32[16,256], index: 1, kind: input, shape index: {}]   ;;  %s245_s2 = inlined_call_operand.vmem [shape: f32[1,256], index: 2, kind: input, shape index: {}]   ;;  %s246_s3 = inlined_call_operand.hbm [shape: f32[16,256], index: 3, kind: output, shape index: {}]  }
   0x1   :  { %9 = vsyncpa [#allocation6], 0 }
   0x2   :  { %10 = vsyncpa [#allocation4], 0  ;;  %s170_s12 = smov [#allocation2]   ;;  %s98_s16 = scalar_lea.hbm %s243_s0, 512 }
   0x3   :  { %s16_s13 = sshll.u32 %s170_s12, 4  ;;  %p99_p0 = scmp.ne.s32.totalorder %s243_s0, %s98_s16  ;;  %s17_s13 = int_to_ptr.vmem [resolvable:$true] %s16_s13 }
   0x4   :  { %p102_p1 = scmp.lt.u32.totalorder %s98_s16, %s243_s0 }
   0x6   :  { %p104_p2 = pnand %p102_p1, %p99_p0 }
   0x8   :  { %107 = shalt.err (!%p104_p2)
}
   0x9   :  { %s108_s21 = scalar_lea.vmem %s17_s13, 512  ;;  %p113_p4 = scmp.lt.s32.totalorder %s17_s13, %s17_s13 }
   0xa   :  { %p109_p3 = scmp.ne.s32.totalorder %s17_s13, %s108_s21  ;;  %p114_p5 = scmp.lt.s32.totalorder %s108_s21, %s108_s21 }
   0xc   :  { %p115_p6 = por %p114_p5, %p113_p4 }
   0xe   :  { %p116_p7 = pnand %p115_p6, %p109_p3 }
  0x10   :  { %119 = shalt.err (!%p116_p7)
}
  0x11   :  { %s171_s22 = smov 256   ;;  %s172_s23 = smov 16  }
  0x12   :  { %22 = dma.hbm_to_vmem [thread:$0]  %s243_s0, 512, %s17_s13, [#allocation3], %s171_s22, %s171_s22, %s172_s23  }
  0x13   :  { %s173_s26 = smov [#allocation5]   ;;  %s120_s30 = scalar_lea.hbm %s244_s1, 512 }
  0x14   :  { %s28_s27 = sshll.u32 %s173_s26, 4  ;;  %p121_p8 = scmp.ne.s32.totalorder %s244_s1, %s120_s30  ;;  %s29_s27 = int_to_ptr.vmem [resolvable:$true] %s28_s27 }
  0x15   :  { %p124_p9 = scmp.lt.u32.totalorder %s120_s30, %s244_s1 }
  0x17   :  { %p126_p10 = pnand %p124_p9, %p121_p8 }
  0x19   :  { %129 = shalt.err (!%p126_p10)
}
  0x1a   :  { %s130_s8 = scalar_lea.vmem %s29_s27, 512  ;;  %p135_p12 = scmp.lt.s32.totalorder %s29_s27, %s29_s27 }
  0x1b   :  { %p131_p11 = scmp.ne.s32.totalorder %s29_s27, %s130_s8  ;;  %p136_p13 = scmp.lt.s32.totalorder %s130_s8, %s130_s8 }
  0x1d   :  { %p137_p0 = por %p136_p13, %p135_p12 }
  0x1f   :  { %p138_p1 = pnand %p137_p0, %p131_p11 }
  0x21   :  { %141 = shalt.err (!%p138_p1)
}
  0x22   :  { %34 = dma.hbm_to_vmem [thread:$0]  %s244_s1, 512, %s29_s27, [#allocation6], %s171_s22, %s171_s22, %s172_s23  }
  0x23   :  { %164 = dma.done.wait [#allocation3], 512  }
  0x24   :  { %165 = vsyncadd [#allocation3], 4294966784 }
  0x25   :  { %166 = dma.done.wait [#allocation6], 512  }
  0x26   :  { %167 = vsyncadd [#allocation6], 4294966784  ;;  %v57_v0 = vlaneseq  ;;  %v43_v4 = vld [vmem:[#allocation2] sm:$0xff]  ;;  %v44_v9 = vld [vmem:[#allocation2 + $0x8] sm:$0xff]  ;;  %s174_s1 = smov [#allocation7]  }
  0x27   :  { %v47_v5 = vld [vmem:[#allocation5] sm:$0xff]  ;;  %v48_v10 = vld [vmem:[#allocation5 + $0x8] sm:$0xff]  ;;  %v45_v12 = vld [vmem:[#allocation2 + $0x10] sm:$0xff]  ;;  %s80_s12 = sshll.u32 %s174_s1, 4  ;;  %s81_s12 = int_to_ptr.vmem [resolvable:$true] %s80_s12 }
  0x28   :  { %v58_v1 = vshrl.u32 %v57_v0, 7  ;;  %v55_v6 = vld [vmem:[%s245_s2] sm:$0x3]  ;;  %v51_v7 = vadd.f32 %v47_v5, %v43_v4  ;;  %v52_v13 = vadd.f32 %v48_v10, %v44_v9  ;;  %v49_v14 = vld [vmem:[#allocation5 + $0x10] sm:$0xff]  ;;  %v46_v15 = vld [vmem:[#allocation2 + $0x18] sm:$0xff]  ;;  %s142_s2 = scalar_lea.vmem %s81_s12, 512  ;;  %p147_p3 = scmp.lt.s32.totalorder %s81_s12, %s81_s12 }
  0x29   :  { %v50_v16 = vld [vmem:[#allocation5 + $0x18] sm:$0xff]  ;;  %v53_v18 = vadd.f32 %v49_v14, %v45_v12  ;;  %p143_p2 = scmp.ne.s32.totalorder %s81_s12, %s142_s2  ;;  %p148_p4 = scmp.lt.s32.totalorder %s142_s2, %s142_s2 }
  0x2a   :  { %v59_v2 = vsub.s32 0, %v58_v1  ;;  %v63_v3 = vsub.s32 1, %v58_v1  ;;  %v54_v19 = vadd.f32 %v50_v16, %v46_v15 }
  0x2b   :  { %p149_p5 = por %p148_p4, %p147_p3 }
  0x2c   :  { %v60_v8 = vrot.slane %v55_v6, %v59_v2  ;;  %v64_v11 = vrot.slane %v55_v6, %v63_v3 }
  0x2d   :  { %p150_p6 = pnand %p149_p5, %p143_p2 }
  0x2e   :  { %v67_v17 = vadd.f32 %v60_v8, %v51_v7  ;;  %v68_v20 = vadd.f32 %v64_v11, %v52_v13  ;;  %v69_v21 = vadd.f32 %v60_v8, %v53_v18  ;;  %v70_v22 = vadd.f32 %v64_v11, %v54_v19 }
  0x30   :  { %71 = vst [vmem:[#allocation7] sm:$0xff] %v67_v17  ;;  %72 = vst [vmem:[#allocation7 + $0x8] sm:$0xff] %v68_v20 }
  0x31   :  { %73 = vst [vmem:[#allocation7 + $0x10] sm:$0xff] %v69_v21  ;;  %74 = vst [vmem:[#allocation7 + $0x18] sm:$0xff] %v70_v22 }
  0x32   :  { %153 = shalt.err (!%p150_p6)
}
  0x33   :  { %s154_s15 = scalar_lea.hbm %s246_s3, 512 }
  0x34   :  { %p155_p7 = scmp.ne.s32.totalorder %s246_s3, %s154_s15  ;;  %p158_p8 = scmp.lt.u32.totalorder %s154_s15, %s246_s3 }
  0x36   :  { %p160_p9 = pnand %p158_p8, %p155_p7 }
  0x38   :  { %163 = shalt.err (!%p160_p9)
}
  0x39   :  { %86 = dma.vmem_to_hbm [thread:$0]  %s81_s12, 512, %s246_s3, [#allocation4], %s171_s22, %s171_s22, %s172_s23  }
  0x3a   :  { %168 = dma.done.wait [#allocation4], 512  }
  0x3b   :  { %169 = vsyncadd [#allocation4], 4294966784 }
  0x3c   :  { %90 = vsyncpa [#allocation3], 1 }
  0x3d   :  { %91 = vsyncpa [#allocation6], 1 }
  0x3e   :  { %92 = vsyncpa [#allocation4], 1 }

</bundles_post_ra>
